<compile_context>
chip_gen: v5e
topology: v5e:2x2
jax: 0.10.0
libtpu: 0.0.40
codegen_flags: <defaults>
</compile_context>

<pallas_src>
import functools

import jax
import jax.numpy as jnp
from jax.experimental import pallas as pl
from jax.experimental.pallas import tpu as pltpu


def _altclip_attn_kernel(x_ref, wqkv_ref, bqkv_ref, wo_ref, bo_ref, mask_ref,
                         out_ref, ctx_ref, *, num_heads, head_dim, causal,
                         seq_len):
    """One grid step = one batch element; all heads processed here."""
    H = num_heads * head_dim
    compute_dtype = wqkv_ref.dtype          # weights arrive pre-cast

    x = x_ref[0]                            # [S, H]
    if x.dtype != compute_dtype:
        x = x.astype(compute_dtype)

    # Fused QKV projection: one wide MXU matmul, f32 accumulation + f32 bias.
    # (scale is already folded into W_q / b_q.)
    qkv_f32 = jnp.dot(x, wqkv_ref[...],
                      preferred_element_type=jnp.float32) + bqkv_ref[...]  # [S,3H] f32
    # Single bulk cast for all MXU operands of the attention phase.
    qkv = qkv_f32.astype(compute_dtype)                                    # [S,3H]

    # Additive mask. Padding mask is DMA'd ([Qm,S], f32); the causal term is
    # generated in-kernel (VPU iota compare) instead of being DMA'd as [S,S].
    full_mask = mask_ref[0, 0]                                             # [Qm,S]
    if causal:
        row = jax.lax.broadcasted_iota(jnp.int32, (seq_len, seq_len), 0)
        col = jax.lax.broadcasted_iota(jnp.int32, (seq_len, seq_len), 1)
        causal_bias = jnp.where(col <= row, 0.0, -1e9).astype(jnp.float32)
        full_mask = causal_bias + full_mask                                # [S,S]

    for h in range(num_heads):              # static unroll over heads
        lo = h * head_dim
        q = qkv[:, lo:lo + head_dim]                                       # [S,d]
        k = qkv[:, H + lo:H + lo + head_dim]                               # [S,d]
        v = qkv[:, 2 * H + lo:2 * H + lo + head_dim]                       # [S,d]

        # Q K^T without materializing a transpose: contract the last dims.
        scores = jax.lax.dot_general(
            q, k, dimension_numbers=(((1,), (1,)), ((), ())),
            preferred_element_type=jnp.float32)                            # [S,S] f32
        scores = scores + full_mask

        # Numerically stable softmax (f32), denominator via EUP vrcp.
        m = jnp.max(scores, axis=-1, keepdims=True)
        e = jnp.exp(scores - m)
        denom = jnp.sum(e, axis=-1, keepdims=True)
        probs = e * pl.reciprocal(denom, approx=True)                      # [S,S] f32

        # TODO(synk): attention-prob dropout is identity here (eval / p=0.0).
        ctx_ref[:, lo:lo + head_dim] = jnp.dot(
            probs.astype(compute_dtype), v,
            preferred_element_type=jnp.float32)                            # [S,d] f32

    # Fused output projection (out_proj) from the ctx scratch.
    y = jnp.dot(ctx_ref[...].astype(compute_dtype), wo_ref[...],
                preferred_element_type=jnp.float32) + bo_ref[...]          # [S,H] f32
    out_ref[0] = y.astype(out_ref.dtype)


def prepare_altclip_attention_params(wq, bq, wk, bk, wv, bv, wo, bo, *,
                                     num_heads, compute_dtype=jnp.bfloat16):
    """One-time repack of the nn.Linear parameters (outside the hot path).

    HF stores Linear.weight as [out, in] with y = x @ W.T + b, so we transpose
    once, fold the 1/sqrt(head_dim) scale into W_q/b_q, pack q|k|v along the
    output dimension, and pre-cast the weights to the MXU compute dtype.
    Biases stay in f32 (added to the f32 accumulator).
    """
    H = wq.shape[0]
    head_dim = H // num_heads
    scale = float(head_dim) ** -0.5

    wqkv = jnp.concatenate([wq.T * scale, wk.T, wv.T], axis=1)             # [H,3H]
    bqkv = jnp.concatenate([bq * scale, bk, bv]).reshape(1, 3 * H)         # [1,3H]
    return (wqkv.astype(compute_dtype),
            bqkv.astype(jnp.float32),
            wo.T.astype(compute_dtype),
            bo.reshape(1, H).astype(jnp.float32))


def _vmem_limit_bytes(S, H, Qm, x_itemsize, w_itemsize):
    """Rough per-step VMEM footprint with headroom."""
    weights = (H * 3 * H + H * H) * w_itemsize + 4 * H * 4                 # resident
    io = 2 * 2 * (S * H * x_itemsize)                                      # x+out, dbl-buf
    mask = 2 * (Qm * S * 4)
    qkv = S * 3 * H * (4 + w_itemsize)                                     # f32 + cast copy
    attn_tmp = 6 * S * S * 4                                               # scores/e/probs/mask
    ctx = S * H * 4
    total = weights + io + mask + qkv + attn_tmp + ctx
    return int(min(max(int(total * 1.5), 32 << 20), 100 << 20))


def altclip_attention(hidden_states, params, attention_mask=None,
                      causal_attention_mask=None, *, num_heads, head_dim,
                      causal=False):
    """hidden_states [B,S,H] -> attn_output [B,S,H].

    `causal=True` generates the standard causal mask in-kernel (preferred);
    alternatively a tensor `causal_attention_mask` [1|B,1,S,S] is combined
    with `attention_mask` exactly as the module does.
    (attn_weights are not returned; output_attentions=False path.)
    """
    wqkv, bqkv, wo_t, bo = params
    B, S, H = hidden_states.shape
    assert H == num_heads * head_dim

    if causal_attention_mask is not None:
        # General path: combine masks exactly as the module does.
        if attention_mask is not None:
            mask = attention_mask + causal_attention_mask
        else:
            mask = causal_attention_mask
    elif attention_mask is not None:
        mask = attention_mask
    else:
        mask = jnp.zeros((1, 1, 1, S), dtype=jnp.float32)
    mask = mask.astype(jnp.float32)

    Bm, _, Qm, Sm = mask.shape
    assert Sm == S and Qm in (1, S) and Bm in (1, B)
    mask_index_map = (lambda b: (b, 0, 0, 0)) if Bm > 1 else (lambda b: (0, 0, 0, 0))

    kernel = functools.partial(_altclip_attn_kernel, num_heads=num_heads,
                               head_dim=head_dim, causal=causal, seq_len=S)

    in_specs = [
        pl.BlockSpec((1, S, H), lambda b: (b, 0, 0)),      # hidden_states
        pl.BlockSpec((H, 3 * H), lambda b: (0, 0)),        # packed QKV weights (resident)
        pl.BlockSpec((1, 3 * H), lambda b: (0, 0)),        # packed QKV bias (f32)
        pl.BlockSpec((H, H), lambda b: (0, 0)),            # out_proj weight (resident)
        pl.BlockSpec((1, H), lambda b: (0, 0)),            # out_proj bias (f32)
        pl.BlockSpec((1, 1, Qm, S), mask_index_map),       # additive mask
    ]
    out_specs = pl.BlockSpec((1, S, H), lambda b: (b, 0, 0))  # direct [B,S,H] output

    vmem_limit = _vmem_limit_bytes(
        S, H, Qm, jnp.dtype(hidden_states.dtype).itemsize,
        jnp.dtype(wqkv.dtype).itemsize)

    out = pl.pallas_call(
        kernel,
        out_shape=jax.ShapeDtypeStruct((B, S, H), hidden_states.dtype),
        grid_spec=pltpu.PrefetchScalarGridSpec(
            num_scalar_prefetch=0,
            grid=(B,),
            in_specs=in_specs,
            out_specs=out_specs,
            scratch_shapes=[pltpu.VMEM((S, H), jnp.float32)],  # ctx accumulator
        ),
        compiler_params=pltpu.CompilerParams(
            dimension_semantics=("parallel",),
            vmem_limit_bytes=vmem_limit),
    )(hidden_states, wqkv, bqkv, wo_t, bo, mask)
    return out


def _reference(x, wq, bq, wk, bk, wv, bv, wo, bo,
               attention_mask, causal_attention_mask, num_heads, head_dim):
    """Plain-JAX port of AltCLIPAttention.forward (eager attention, eval)."""
    B, S, H = x.shape
    scale = float(head_dim) ** -0.5

    def proj(w, b):
        y = x @ w.T + b
        return y.reshape(B, S, num_heads, head_dim).transpose(0, 2, 1, 3)

    q, k, v = proj(wq, bq), proj(wk, bk), proj(wv, bv)

    if attention_mask is not None and causal_attention_mask is not None:
        mask = attention_mask + causal_attention_mask
    elif causal_attention_mask is not None:
        mask = causal_attention_mask
    else:
        mask = attention_mask

    scores = jnp.einsum("bhqd,bhkd->bhqk", q, k) * scale
    if mask is not None:
        scores = scores + mask
    probs = jax.nn.softmax(scores, axis=-1)
    ctx = jnp.einsum("bhqk,bhkd->bhqd", probs, v)
    ctx = ctx.transpose(0, 2, 1, 3).reshape(B, S, H)
    return ctx @ wo.T + bo


if __name__ == "__main__":
    # Small config consistent with the module (embed_dim divisible by num_heads).
    B, S, H, num_heads = 2, 8, 32, 4
    head_dim = H // num_heads

    key = jax.random.PRNGKey(0)
    (kx, kwq, kwk, kwv, kbq, kbk, kbv, kwo, kbo, km) = jax.random.split(key, 10)

    hidden_states = jax.random.normal(kx, (B, S, H), dtype=jnp.float32)
    # nn.Linear(H, H) weights: [out_features, in_features]
    wq = jax.random.normal(kwq, (H, H), dtype=jnp.float32) * 0.05
    wk = jax.random.normal(kwk, (H, H), dtype=jnp.float32) * 0.05
    wv = jax.random.normal(kwv, (H, H), dtype=jnp.float32) * 0.05
    wo = jax.random.normal(kwo, (H, H), dtype=jnp.float32) * 0.05
    bq = jax.random.normal(kbq, (H,), dtype=jnp.float32) * 0.01
    bk = jax.random.normal(kbk, (H,), dtype=jnp.float32) * 0.01
    bv = jax.random.normal(kbv, (H,), dtype=jnp.float32) * 0.01
    bo = jax.random.normal(kbo, (H,), dtype=jnp.float32) * 0.01

    # Additive padding mask [B,1,1,S] (0 = keep, -1e9 = drop) plus a causal
    # mask [1,1,S,S], exercising the module's mask-combination branch.
    keep = (jax.random.uniform(km, (B, S)) > 0.2).astype(jnp.float32)
    attention_mask = ((1.0 - keep) * -1e9).reshape(B, 1, 1, S)
    causal_attention_mask = jnp.triu(
        jnp.full((S, S), -1e9, dtype=jnp.float32), k=1).reshape(1, 1, S, S)

    ref = _reference(hidden_states, wq, bq, wk, bk, wv, bv, wo, bo,
                     attention_mask, causal_attention_mask, num_heads, head_dim)

    # One-time parameter repack + pre-cast (outside the per-call hot path).
    params_f32 = prepare_altclip_attention_params(
        wq, bq, wk, bk, wv, bv, wo, bo,
        num_heads=num_heads, compute_dtype=jnp.float32)
    params_bf16 = prepare_altclip_attention_params(
        wq, bq, wk, bk, wv, bv, wo, bo,
        num_heads=num_heads, compute_dtype=jnp.bfloat16)

    # 1) f32 operands, causal mask generated in-kernel (no [S,S] mask DMA).
    out_f32 = altclip_attention(hidden_states, params_f32, attention_mask,
                                None, num_heads=num_heads, head_dim=head_dim,
                                causal=True)
    out_f32 = jax.block_until_ready(out_f32)
    assert out_f32.shape == (B, S, H)
    assert jnp.allclose(out_f32, ref, atol=5e-3, rtol=5e-3), "f32/causal-flag mismatch"

    # 2) f32 operands, general tensor-mask path (module's mask combination).
    out_tensor_mask = altclip_attention(hidden_states, params_f32,
                                        attention_mask, causal_attention_mask,
                                        num_heads=num_heads, head_dim=head_dim,
                                        causal=False)
    out_tensor_mask = jax.block_until_ready(out_tensor_mask)
    assert jnp.allclose(out_tensor_mask, ref, atol=5e-3, rtol=5e-3), \
        "f32/tensor-mask mismatch"

    # 3) bf16 operands (v6e/v7x MXU default), f32 accumulation + f32 softmax.
    out_bf16 = altclip_attention(hidden_states, params_bf16, attention_mask,
                                 None, num_heads=num_heads, head_dim=head_dim,
                                 causal=True)
    out_bf16 = jax.block_until_ready(out_bf16)
    assert jnp.allclose(out_bf16, ref, atol=5e-2, rtol=5e-2), "bf16 path mismatch"

    print("KERNEL_OK")
</pallas_src>

<mosaic_0001>
module attributes {stable_mosaic.version = 11 : i64} {
  func.func @_altclip_attn_kernel(%arg0: i32, %arg1: memref<1x8x32xf32, #tpu.memory_space<vmem>>, %arg2: memref<32x96xf32, #tpu.memory_space<vmem>>, %arg3: memref<1x96xf32, #tpu.memory_space<vmem>>, %arg4: memref<32x32xf32, #tpu.memory_space<vmem>>, %arg5: memref<1x32xf32, #tpu.memory_space<vmem>>, %arg6: memref<1x1x1x8xf32, #tpu.memory_space<vmem>>, %arg7: memref<1x8x32xf32, #tpu.memory_space<vmem>>, %arg8: memref<8x32xf32, #tpu.memory_space<vmem>>) attributes {dimension_semantics = [#tpu.dimension_semantics<parallel>], iteration_bounds = array<i64: 2>, scalar_prefetch = 0 : i64, scratch_operands = 1 : i64, tpu.core_type = #tpu.core_type<tc>, window_params = [{transform_indices = @transform_0, window_bounds = array<i64: 1, 8, 32>}, {pipeline_mode = #tpu.pipeline_mode<synchronous>, transform_indices = @transform_1, window_bounds = array<i64: 32, 96>}, {pipeline_mode = #tpu.pipeline_mode<synchronous>, transform_indices = @transform_2, window_bounds = array<i64: 1, 96>}, {pipeline_mode = #tpu.pipeline_mode<synchronous>, transform_indices = @transform_3, window_bounds = array<i64: 32, 32>}, {pipeline_mode = #tpu.pipeline_mode<synchronous>, transform_indices = @transform_4, window_bounds = array<i64: 1, 32>}, {transform_indices = @transform_5, window_bounds = array<i64: 1, 1, 1, 8>}, {transform_indices = @transform_6, window_bounds = array<i64: 1, 8, 32>}]} {
    %c0 = arith.constant 0 : index
    %c0_0 = arith.constant 0 : index
    %c0_1 = arith.constant 0 : index
    %0 = vector.load %arg1[%c0, %c0_0, %c0_1] : memref<1x8x32xf32, #tpu.memory_space<vmem>>, vector<1x8x32xf32>
    %1 = vector.shape_cast %0 : vector<1x8x32xf32> to vector<8x32xf32>
    %c0_2 = arith.constant 0 : index
    %c0_3 = arith.constant 0 : index
    %2 = vector.load %arg2[%c0_2, %c0_3] : memref<32x96xf32, #tpu.memory_space<vmem>>, vector<32x96xf32>
    %cst = arith.constant dense<0.000000e+00> : vector<8x96xf32>
    %3 = tpu.matmul %1, %2, %cst {dimension_numbers = #tpu.dot_dimension_numbers<[1], [0], [0], [1], [0, 0, 1, 1], [], []>} : vector<8x32xf32>, vector<32x96xf32>, vector<8x96xf32> -> vector<8x96xf32>
    %c0_4 = arith.constant 0 : index
    %c0_5 = arith.constant 0 : index
    %4 = vector.load %arg3[%c0_4, %c0_5] : memref<1x96xf32, #tpu.memory_space<vmem>>, vector<1x96xf32>
    %5 = vector.broadcast %4 : vector<1x96xf32> to vector<8x96xf32>
    %6 = arith.addf %3, %5 : vector<8x96xf32>
    %c0_6 = arith.constant 0 : index
    %c0_7 = arith.constant 0 : index
    %c0_8 = arith.constant 0 : index
    %c0_9 = arith.constant 0 : index
    %7 = vector.load %arg6[%c0_6, %c0_7, %c0_8, %c0_9] : memref<1x1x1x8xf32, #tpu.memory_space<vmem>>, vector<1x1x1x8xf32>
    %8 = vector.shape_cast %7 : vector<1x1x1x8xf32> to vector<1x8xf32>
    %9 = tpu.iota {dimensions = array<i32: 0>} : vector<8x8xi32>
    %10 = tpu.iota {dimensions = array<i32: 1>} : vector<8x8xi32>
    %11 = arith.cmpi sle, %10, %9 : vector<8x8xi32>
    %cst_10 = arith.constant 0.000000e+00 : f32
    %cst_11 = arith.constant -1.000000e+09 : f32
    %12 = vector.broadcast %cst_10 : f32 to vector<8x8xf32>
    %13 = vector.broadcast %cst_11 : f32 to vector<8x8xf32>
    %14 = arith.select %11, %12, %13 : vector<8x8xi1>, vector<8x8xf32>
    %15 = vector.broadcast %8 : vector<1x8xf32> to vector<8x8xf32>
    %16 = arith.addf %14, %15 : vector<8x8xf32>
    %17 = vector.extract_strided_slice %6 {offsets = [0, 0], sizes = [8, 8], strides = [1, 1]} : vector<8x96xf32> to vector<8x8xf32>
    %18 = vector.extract_strided_slice %6 {offsets = [0, 32], sizes = [8, 8], strides = [1, 1]} : vector<8x96xf32> to vector<8x8xf32>
    %19 = vector.extract_strided_slice %6 {offsets = [0, 64], sizes = [8, 8], strides = [1, 1]} : vector<8x96xf32> to vector<8x8xf32>
    %cst_12 = arith.constant dense<0.000000e+00> : vector<8x8xf32>
    %20 = tpu.matmul %17, %18, %cst_12 {dimension_numbers = #tpu.dot_dimension_numbers<[1], [1], [0], [0], [0, 0, 1, 0], [], []>} : vector<8x8xf32>, vector<8x8xf32>, vector<8x8xf32> -> vector<8x8xf32>
    %21 = arith.addf %20, %16 : vector<8x8xf32>
    %cst_13 = arith.constant dense<0xFF800000> : vector<8xf32>
    %22 = vector.multi_reduction <maximumf>, %21, %cst_13 [1] : vector<8x8xf32> to vector<8xf32>
    %23 = vector.shape_cast %22 : vector<8xf32> to vector<8x1xf32>
    %24 = vector.broadcast %23 : vector<8x1xf32> to vector<8x8xf32>
    %25 = arith.subf %21, %24 : vector<8x8xf32>
    %26 = math.exp %25 : vector<8x8xf32>
    %cst_14 = arith.constant dense<0.000000e+00> : vector<8xf32>
    %27 = vector.multi_reduction <add>, %26, %cst_14 [1] : vector<8x8xf32> to vector<8xf32>
    %28 = vector.shape_cast %27 : vector<8xf32> to vector<8x1xf32>
    %29 = tpu.reciprocal %28 {approx = true} : vector<8x1xf32> -> vector<8x1xf32>
    %30 = vector.broadcast %29 : vector<8x1xf32> to vector<8x8xf32>
    %31 = arith.mulf %26, %30 : vector<8x8xf32>
    %cst_15 = arith.constant dense<0.000000e+00> : vector<8x8xf32>
    %32 = tpu.matmul %31, %19, %cst_15 {dimension_numbers = #tpu.dot_dimension_numbers<[1], [0], [0], [1], [0, 0, 1, 1], [], []>} : vector<8x8xf32>, vector<8x8xf32>, vector<8x8xf32> -> vector<8x8xf32>
    %c0_16 = arith.constant 0 : index
    %c0_17 = arith.constant 0 : index
    %33 = vector.load %arg8[%c0_16, %c0_17] : memref<8x32xf32, #tpu.memory_space<vmem>>, vector<8x8xf32>
    tpu.vector_store %arg8[%c0_16, %c0_17], %32 {strides = array<i32>} : memref<8x32xf32, #tpu.memory_space<vmem>>, vector<8x8xf32>,
    %34 = vector.extract_strided_slice %6 {offsets = [0, 8], sizes = [8, 8], strides = [1, 1]} : vector<8x96xf32> to vector<8x8xf32>
    %35 = vector.extract_strided_slice %6 {offsets = [0, 40], sizes = [8, 8], strides = [1, 1]} : vector<8x96xf32> to vector<8x8xf32>
    %36 = vector.extract_strided_slice %6 {offsets = [0, 72], sizes = [8, 8], strides = [1, 1]} : vector<8x96xf32> to vector<8x8xf32>
    %cst_18 = arith.constant dense<0.000000e+00> : vector<8x8xf32>
    %37 = tpu.matmul %34, %35, %cst_18 {dimension_numbers = #tpu.dot_dimension_numbers<[1], [1], [0], [0], [0, 0, 1, 0], [], []>} : vector<8x8xf32>, vector<8x8xf32>, vector<8x8xf32> -> vector<8x8xf32>
    %38 = arith.addf %37, %16 : vector<8x8xf32>
    %cst_19 = arith.constant dense<0xFF800000> : vector<8xf32>
    %39 = vector.multi_reduction <maximumf>, %38, %cst_19 [1] : vector<8x8xf32> to vector<8xf32>
    %40 = vector.shape_cast %39 : vector<8xf32> to vector<8x1xf32>
    %41 = vector.broadcast %40 : vector<8x1xf32> to vector<8x8xf32>
    %42 = arith.subf %38, %41 : vector<8x8xf32>
    %43 = math.exp %42 : vector<8x8xf32>
    %cst_20 = arith.constant dense<0.000000e+00> : vector<8xf32>
    %44 = vector.multi_reduction <add>, %43, %cst_20 [1] : vector<8x8xf32> to vector<8xf32>
    %45 = vector.shape_cast %44 : vector<8xf32> to vector<8x1xf32>
    %46 = tpu.reciprocal %45 {approx = true} : vector<8x1xf32> -> vector<8x1xf32>
    %47 = vector.broadcast %46 : vector<8x1xf32> to vector<8x8xf32>
    %48 = arith.mulf %43, %47 : vector<8x8xf32>
    %cst_21 = arith.constant dense<0.000000e+00> : vector<8x8xf32>
    %49 = tpu.matmul %48, %36, %cst_21 {dimension_numbers = #tpu.dot_dimension_numbers<[1], [0], [0], [1], [0, 0, 1, 1], [], []>} : vector<8x8xf32>, vector<8x8xf32>, vector<8x8xf32> -> vector<8x8xf32>
    %c0_22 = arith.constant 0 : index
    %c8 = arith.constant 8 : index
    %50 = vector.load %arg8[%c0_22, %c8] : memref<8x32xf32, #tpu.memory_space<vmem>>, vector<8x8xf32>
    tpu.vector_store %arg8[%c0_22, %c8], %49 {strides = array<i32>} : memref<8x32xf32, #tpu.memory_space<vmem>>, vector<8x8xf32>,
    %51 = vector.extract_strided_slice %6 {offsets = [0, 16], sizes = [8, 8], strides = [1, 1]} : vector<8x96xf32> to vector<8x8xf32>
    %52 = vector.extract_strided_slice %6 {offsets = [0, 48], sizes = [8, 8], strides = [1, 1]} : vector<8x96xf32> to vector<8x8xf32>
    %53 = vector.extract_strided_slice %6 {offsets = [0, 80], sizes = [8, 8], strides = [1, 1]} : vector<8x96xf32> to vector<8x8xf32>
    %cst_23 = arith.constant dense<0.000000e+00> : vector<8x8xf32>
    %54 = tpu.matmul %51, %52, %cst_23 {dimension_numbers = #tpu.dot_dimension_numbers<[1], [1], [0], [0], [0, 0, 1, 0], [], []>} : vector<8x8xf32>, vector<8x8xf32>, vector<8x8xf32> -> vector<8x8xf32>
    %55 = arith.addf %54, %16 : vector<8x8xf32>
    %cst_24 = arith.constant dense<0xFF800000> : vector<8xf32>
    %56 = vector.multi_reduction <maximumf>, %55, %cst_24 [1] : vector<8x8xf32> to vector<8xf32>
    %57 = vector.shape_cast %56 : vector<8xf32> to vector<8x1xf32>
    %58 = vector.broadcast %57 : vector<8x1xf32> to vector<8x8xf32>
    %59 = arith.subf %55, %58 : vector<8x8xf32>
    %60 = math.exp %59 : vector<8x8xf32>
    %cst_25 = arith.constant dense<0.000000e+00> : vector<8xf32>
    %61 = vector.multi_reduction <add>, %60, %cst_25 [1] : vector<8x8xf32> to vector<8xf32>
    %62 = vector.shape_cast %61 : vector<8xf32> to vector<8x1xf32>
    %63 = tpu.reciprocal %62 {approx = true} : vector<8x1xf32> -> vector<8x1xf32>
    %64 = vector.broadcast %63 : vector<8x1xf32> to vector<8x8xf32>
    %65 = arith.mulf %60, %64 : vector<8x8xf32>
    %cst_26 = arith.constant dense<0.000000e+00> : vector<8x8xf32>
    %66 = tpu.matmul %65, %53, %cst_26 {dimension_numbers = #tpu.dot_dimension_numbers<[1], [0], [0], [1], [0, 0, 1, 1], [], []>} : vector<8x8xf32>, vector<8x8xf32>, vector<8x8xf32> -> vector<8x8xf32>
    %c0_27 = arith.constant 0 : index
    %c16 = arith.constant 16 : index
    %67 = vector.load %arg8[%c0_27, %c16] : memref<8x32xf32, #tpu.memory_space<vmem>>, vector<8x8xf32>
    tpu.vector_store %arg8[%c0_27, %c16], %66 {strides = array<i32>} : memref<8x32xf32, #tpu.memory_space<vmem>>, vector<8x8xf32>,
    %68 = vector.extract_strided_slice %6 {offsets = [0, 24], sizes = [8, 8], strides = [1, 1]} : vector<8x96xf32> to vector<8x8xf32>
    %69 = vector.extract_strided_slice %6 {offsets = [0, 56], sizes = [8, 8], strides = [1, 1]} : vector<8x96xf32> to vector<8x8xf32>
    %70 = vector.extract_strided_slice %6 {offsets = [0, 88], sizes = [8, 8], strides = [1, 1]} : vector<8x96xf32> to vector<8x8xf32>
    %cst_28 = arith.constant dense<0.000000e+00> : vector<8x8xf32>
    %71 = tpu.matmul %68, %69, %cst_28 {dimension_numbers = #tpu.dot_dimension_numbers<[1], [1], [0], [0], [0, 0, 1, 0], [], []>} : vector<8x8xf32>, vector<8x8xf32>, vector<8x8xf32> -> vector<8x8xf32>
    %72 = arith.addf %71, %16 : vector<8x8xf32>
    %cst_29 = arith.constant dense<0xFF800000> : vector<8xf32>
    %73 = vector.multi_reduction <maximumf>, %72, %cst_29 [1] : vector<8x8xf32> to vector<8xf32>
    %74 = vector.shape_cast %73 : vector<8xf32> to vector<8x1xf32>
    %75 = vector.broadcast %74 : vector<8x1xf32> to vector<8x8xf32>
    %76 = arith.subf %72, %75 : vector<8x8xf32>
    %77 = math.exp %76 : vector<8x8xf32>
    %cst_30 = arith.constant dense<0.000000e+00> : vector<8xf32>
    %78 = vector.multi_reduction <add>, %77, %cst_30 [1] : vector<8x8xf32> to vector<8xf32>
    %79 = vector.shape_cast %78 : vector<8xf32> to vector<8x1xf32>
    %80 = tpu.reciprocal %79 {approx = true} : vector<8x1xf32> -> vector<8x1xf32>
    %81 = vector.broadcast %80 : vector<8x1xf32> to vector<8x8xf32>
    %82 = arith.mulf %77, %81 : vector<8x8xf32>
    %cst_31 = arith.constant dense<0.000000e+00> : vector<8x8xf32>
    %83 = tpu.matmul %82, %70, %cst_31 {dimension_numbers = #tpu.dot_dimension_numbers<[1], [0], [0], [1], [0, 0, 1, 1], [], []>} : vector<8x8xf32>, vector<8x8xf32>, vector<8x8xf32> -> vector<8x8xf32>
    %c0_32 = arith.constant 0 : index
    %c24 = arith.constant 24 : index
    %84 = vector.load %arg8[%c0_32, %c24] : memref<8x32xf32, #tpu.memory_space<vmem>>, vector<8x8xf32>
    tpu.vector_store %arg8[%c0_32, %c24], %83 {strides = array<i32>} : memref<8x32xf32, #tpu.memory_space<vmem>>, vector<8x8xf32>,
    %c0_33 = arith.constant 0 : index
    %c0_34 = arith.constant 0 : index
    %85 = vector.load %arg8[%c0_33, %c0_34] : memref<8x32xf32, #tpu.memory_space<vmem>>, vector<8x32xf32>
    %c0_35 = arith.constant 0 : index
    %c0_36 = arith.constant 0 : index
    %86 = vector.load %arg4[%c0_35, %c0_36] : memref<32x32xf32, #tpu.memory_space<vmem>>, vector<32x32xf32>
    %cst_37 = arith.constant dense<0.000000e+00> : vector<8x32xf32>
    %87 = tpu.matmul %85, %86, %cst_37 {dimension_numbers = #tpu.dot_dimension_numbers<[1], [0], [0], [1], [0, 0, 1, 1], [], []>} : vector<8x32xf32>, vector<32x32xf32>, vector<8x32xf32> -> vector<8x32xf32>
    %c0_38 = arith.constant 0 : index
    %c0_39 = arith.constant 0 : index
    %88 = vector.load %arg5[%c0_38, %c0_39] : memref<1x32xf32, #tpu.memory_space<vmem>>, vector<1x32xf32>
    %89 = vector.broadcast %88 : vector<1x32xf32> to vector<8x32xf32>
    %90 = arith.addf %87, %89 : vector<8x32xf32>
    %c0_40 = arith.constant 0 : index
    %c0_41 = arith.constant 0 : index
    %c0_42 = arith.constant 0 : index
    %91 = vector.load %arg7[%c0_40, %c0_41, %c0_42] : memref<1x8x32xf32, #tpu.memory_space<vmem>>, vector<1x8x32xf32>
    %92 = vector.shape_cast %91 : vector<1x8x32xf32> to vector<8x32xf32>
    %93 = vector.shape_cast %90 : vector<8x32xf32> to vector<1x8x32xf32>
    tpu.vector_store %arg7[%c0_40, %c0_41, %c0_42], %93 {strides = array<i32>} : memref<1x8x32xf32, #tpu.memory_space<vmem>>, vector<1x8x32xf32>,
    return
  }
  func.func @transform_0(%arg0: i32) -> (i32, i32, i32) {
    %c0_i32 = arith.constant 0 : i32
    %c0_i32_0 = arith.constant 0 : i32
    %c0_i32_1 = arith.constant 0 : i32
    return %arg0, %c0_i32, %c0_i32_0 : i32, i32, i32
  }
  func.func @transform_1(%arg0: i32) -> (i32, i32) {
    %c0_i32 = arith.constant 0 : i32
    %c0_i32_0 = arith.constant 0 : i32
    %c0_i32_1 = arith.constant 0 : i32
    return %c0_i32, %c0_i32_0 : i32, i32
  }
  func.func @transform_2(%arg0: i32) -> (i32, i32) {
    %c0_i32 = arith.constant 0 : i32
    %c0_i32_0 = arith.constant 0 : i32
    %c0_i32_1 = arith.constant 0 : i32
    return %c0_i32, %c0_i32_0 : i32, i32
  }
  func.func @transform_3(%arg0: i32) -> (i32, i32) {
    %c0_i32 = arith.constant 0 : i32
    %c0_i32_0 = arith.constant 0 : i32
    %c0_i32_1 = arith.constant 0 : i32
    return %c0_i32, %c0_i32_0 : i32, i32
  }
  func.func @transform_4(%arg0: i32) -> (i32, i32) {
    %c0_i32 = arith.constant 0 : i32
    %c0_i32_0 = arith.constant 0 : i32
    %c0_i32_1 = arith.constant 0 : i32
    return %c0_i32, %c0_i32_0 : i32, i32
  }
  func.func @transform_5(%arg0: i32) -> (i32, i32, i32, i32) {
    %c0_i32 = arith.constant 0 : i32
    %c0_i32_0 = arith.constant 0 : i32
    %c0_i32_1 = arith.constant 0 : i32
    %c0_i32_2 = arith.constant 0 : i32
    return %arg0, %c0_i32, %c0_i32_0, %c0_i32_1 : i32, i32, i32, i32
  }
  func.func @transform_6(%arg0: i32) -> (i32, i32, i32) {
    %c0_i32 = arith.constant 0 : i32
    %c0_i32_0 = arith.constant 0 : i32
    %c0_i32_1 = arith.constant 0 : i32
    return %arg0, %c0_i32, %c0_i32_0 : i32, i32, i32
  }
}

</mosaic_0001>

<bundles_post_ra>
// kernel: tpu_custom_call.1
= control target key start
LH: loop header
LB: loop body
LE: loop exit
PB: predicated region body
PF: predicated region fallthrough
CT: control target
= control target key end

     0   :  { %11 = vsyncpa [#allocation4], 0  ;;  %s1416_s0 = inlined_call_operand.hbm [shape: f32[2,8,32], index: 0, kind: input, shape index: {}]   ;;  %s1417_s1 = inlined_call_operand.hbm [shape: f32[32,96], index: 1, kind: input, shape index: {}]   ;;  %s1418_s2 = inlined_call_operand.vmem [shape: f32[1,96], index: 2, kind: input, shape index: {}]   ;;  %s1419_s3 = inlined_call_operand.hbm [shape: f32[32,32], index: 3, kind: input, shape index: {}]   ;;  %s1420_s4 = inlined_call_operand.hbm [shape: f32[1,32], index: 4, kind: input, shape index: {}]   ;;  %s1421_s5 = inlined_call_operand.vmem [shape: f32[2,1,1,8], index: 5, kind: input, shape index: {}]   ;;  %s1422_s6 = inlined_call_operand.hbm [shape: f32[2,8,32], index: 6, kind: output, shape index: {}]  }
   0x1   :  { %13 = vsyncpa [#allocation4 + $0x1], 0 }
   0x2   :  { %14 = vsyncpa [#allocation7], 0 }
   0x3   :  { %15 = vsyncpa [#allocation10], 0 }
   0x4   :  { %16 = vsyncpa [#allocation5], 0 }
   0x5   :  { %18 = vsyncpa [#allocation5 + $0x1], 0  ;;  %s1207_s21 = smov 0   ;;  %s1209_s22 = smov 0  }
   0x6   :  { %s1211_s23 = smov 0   ;;  %s1213_s24 = smov 0  }
   0x7 LB: > { %s202_s27 = sshll.u32 %s1417_s1, 4  ;;  %s1231_s28 = sadd.s32 4294967295, %s1150_s24   ;;  %s1150_s24 = sphi %s1213_s24, %s1433_s24   ;;  %s1146_s23 = sphi %s1211_s23, %s1432_s23   ;;  %s1142_s22 = sphi %s1209_s22, %s1431_s22   ;;  %s1138_s21 = sphi %s1207_s21, %s1430_s21   ;;  %s203_s27 = int_to_ptr.hbm [resolvable:$true] %s202_s27 }
   0x8   : > { %p812_p0 = scmp.ge.s32.totalorder %s1150_s24, 1  ;;  %p45_p1 = scmp.eq.s32.totalorder %s1231_s28, 0 }
   0x9   : > { %p191_p2 = scmp.lt.s32.totalorder %s1150_s24, 3  ;;  %s1152_s30 = smov [#allocation6]  }
   0xa   : > { %s204_s7 = sshll.u32 %s1152_s30, 4  ;;  %s219_s10 = sshll.u32 %s1419_s3, 4  ;;  %s205_s7 = int_to_ptr.vmem [resolvable:$true] %s204_s7  ;;  %s220_s10 = int_to_ptr.hbm [resolvable:$true] %s219_s10 }
   0xb   : > { %p1236_p3 = pnand %p812_p0, %p191_p2  ;;  %s234_s14 = sshll.u32 %s1420_s4, 4  ;;  %s235_s14 = int_to_ptr.hbm [resolvable:$true] %s234_s14 }
   0xc   : > { %s1153_s15 = smov [#allocation8]   ;;  %s1154_s17 = smov 128  }
   0xd   : > { %p859_p4 = pneg %p1236_p3  ;;  %s221_s16 = sshll.u32 %s1153_s15, 4  ;;  %s222_s16 = int_to_ptr.vmem [resolvable:$true] %s221_s16 }
   0xe   : > { %s1155_s18 = smov 8   ;;  %s1156_s19 = smov [#allocation9]  }
   0xf   : > { %p1248_p6 = pnand %p859_p4, %p45_p1  ;;  %s236_s20 = sshll.u32 %s1156_s19, 4  ;;  %s237_s20 = int_to_ptr.vmem [resolvable:$true] %s236_s20 }
  0x10   : > { %s811_s25 = sadd.s32 4294967294, %s1150_s24   ;;  %s1263_s26 = sadd.s32 1, %s1150_s24  }
  0x11   : > { %862 = dma.hbm_to_vmem [thread:$0]  (!%p1248_p6), %s203_s27, 512, %s205_s7, [#allocation7], %s1154_s17, %s1154_s17, %s1155_s18  }
  0x12   : > { %865 = dma.hbm_to_vmem [thread:$0]  (!%p1248_p6), %s220_s10, 512, %s222_s16, [#allocation7], %s1154_s17, %s1154_s17, %s1155_s18  }
  0x13   : > { %868 = dma.hbm_to_vmem [thread:$0]  (!%p1248_p6), %s235_s14, 16, %s237_s20, [#allocation10]  }
  0x14   : > { %s31_s30 = sadd.s32 1, %s1146_s23  ;;  %s28_s27 = ssub.s32 %s1150_s24, %s1263_s26 }
  0x15   : > { %p38_p7 = scmp.ne.s32.totalorder %s1146_s23, %s1142_s22  ;;  %p29_p8 = scmp.eq.s32.totalorder %s28_s27, 0 }
  0x16   : > { %p39_p9 = scmp.eq.s32.totalorder %s1150_s24, 0  ;;  %p44_p10 = scmp.ne.s32.totalorder %s1142_s22, %s1138_s21 }
  0x17   : > { %p178_p11 = scmp.eq.s32.totalorder %s1231_s28, 1  ;;  %p184_p0 = scmp.eq.s32.totalorder %s811_s25, 1 }
  0x18   : > { %s1275_s7 = scalar_select %p29_p8, %s1146_s23, %s31_s30  }
  0x19   : > { %p1279_p12 = por %p45_p1, %p44_p10  ;;  %p1283_p13 = por %p178_p11, %p38_p7 }
  0x1a   : > { %p40_p2 = por %p39_p9, %p38_p7  ;;  %s247_s10 = sand.u32 1, %s1146_s23  }
  0x1b   : > { %p1288_p4 = por %p184_p0, %p44_p10  ;;  %p880_p6 = scmp.lt.s32.totalorder %s1150_s24, 2 }
  0x1c   : > { %s817_s12 = sshll.u32 %s247_s10, 3  ;;  %s818_s13 = sshll.u32 %s1150_s24, 3 }
  0x1d   : > { %s255_s16 = scalar_lea.hbm %s1416_s0, %s818_s13  ;;  %s251_s18 = scalar_lea.vmem [#allocation3], %s817_s12 }
  0x1e   : > { %s257_s17 = sshll.u32 %s255_s16, 4  ;;  %s259_s19 = sshll.u32 %s251_s18, 4  ;;  %s258_s17 = int_to_ptr.hbm [resolvable:$true] %s257_s17  ;;  %s260_s19 = int_to_ptr.vmem [resolvable:$true] %s259_s19 }
  0x1f   : > { %p1297_p8 = pnand %p880_p6, %p40_p2  ;;  %s248_s25 = scalar_lea.sflag [#allocation4], %s247_s10 }
  0x20   : > { %s1046_s30 = sshra.s32 %s258_s17, 4  ;;  %s1053_s12 = scalar_lea.hbm %s1416_s0, 16  ;;  %s1047_s30 = int_to_ptr.hbm [resolvable:$true] %s1046_s30 }
  0x21   : > { %s1048_s27 = scalar_lea.hbm %s1047_s30, 8  ;;  %p1050_p9 = pneg %p1297_p8 }
  0x22   : > { %p1049_p7 = scmp.ne.s32.totalorder %s1047_s30, %s1048_s27  ;;  %p1054_p0 = scmp.lt.s32.totalorder %s1047_s30, %s1416_s0 }
  0x23   : > { %p1055_p2 = scmp.lt.s32.totalorder %s1053_s12, %s1048_s27 }
  0x24   : > { %p1051_p10 = pnand %p1050_p9, %p1049_p7 }
  0x25   : > { %p1056_p6 = por %p1055_p2, %p1054_p0 }
  0x26   : > { %p1052_p11 = pneg %p1051_p10 }
  0x28   : > { %p1057_p5 = pnand %p1056_p6, %p1052_p11 }
  0x2a   : > { %1060 = shalt.err (!%p1057_p5)
}
  0x2b   : > { %872 = dma.hbm_to_vmem [thread:$0]  (!%p1297_p8), %s258_s17, 128, %s260_s19, %s248_s25  }
  0x2c   : > { %274 = sbr.rel (%p1236_p3) target bundleno = 1115 (0x45b), region = 44  ;;  %s1314_s10 = sand.u32 (!%p1236_p3), 1, %s1142_s22  }
  0x2d   : > { %s820_s18 = sshll.u32 (!%p1236_p3), %s1314_s10, 3  ;;  %s277_s13 = scalar_lea.sflag (!%p1236_p3), [#allocation4], %s1314_s10 }
  0x2e   : > { %s280_s30 = scalar_lea.vmem (!%p1236_p3), [#allocation3], %s820_s18 }
  0x31   : > { %1121 = dma.done.wait (%p1279_p12), %s277_s13, 128  }
  0x32   : > { %1123 = vsyncadd (%p1279_p12), %s277_s13, 4294967168 }
  0x33   : > { %1125 = dma.done.wait (%p45_p1), [#allocation7], 1024  }
  0x34   : > { %1127 = vsyncadd (%p45_p1), [#allocation7], 4294966272 }
  0x35   : > { %1129 = dma.done.wait (%p45_p1), [#allocation10], 16  }
  0x36   : > { %1131 = vsyncadd (%p45_p1), [#allocation10], 4294967280  ;;  %v335_v0 = vld [vmem:[#allocation6 + $0x18] sm:$0xff]  ;;  %v334_v1 = vld [vmem:[#allocation6 + $0x10] sm:$0xff]  ;;  %vm340_vm0 = vcmask 261120   ;;  %s1157_s17 = smov 72   ;;  %v365_v15 = vlaneseq }
  0x37   : > { %356 = vmatpush.msra.mxu0 %v335_v0  ;;  %v333_v2 = vld [vmem:[#allocation6 + $0x8] sm:$0xff]  ;;  %v332_v3 = vld [vmem:[#allocation6] sm:$0xff]  ;;  %v331_v4 = vld [vmem:[%s280_s30] sm:$0xff]  ;;  %s1158_s19 = smov 120   ;;  %s1159_s20 = smov 96   ;;  %vm378_vm1 = vcmask 64512  }
  0x38   : > { %v937_v5 = vld [vmem:[%s1418_s2] ss:$0 sm:$0xff]  ;;  %p328_p1 = scmp.lt.s32.totalorder %s1231_s28, 1  ;;  %s1160_s27 = smov 112   ;;  %v366_v16 = vshrl.u32 %v365_v15, 7  ;;  %v368_v17 = vand.u32 127, %v365_v15 }
  0x39   : > { %357 = vmatpush.msra.mxu0 %v334_v1  ;;  %s1161_s14 = smov 80   ;;  %s1162_s13 = smov 88   ;;  %v1164_v19 = vmov -1e+09   ;;  %vm510_vm3 = vcmask 130112   ;;  %vm581_vm4 = vcmask 195712  }
  0x3a   : > { %s1343_s25 = scalar_select %p328_p1, %s1231_s28, 1  ;;  %vm369_vm2 = vcmp.le.s32.totalorder %v368_v17, %v366_v16  ;;  %vm652_vm5 = vcmask 261312  }
  0x3b   : > { %358 = vmatpush.msra.mxu0 %v333_v2  ;;  %s1163_s30 = smov 104   ;;  %v370_v20 = vsel %vm369_vm2, 0.0, %v1164_v19  ;;  %s1165_s29 = smov 64  }
  0x3c   : > { %s330_s16 = scalar_lea.vmem %s1421_s5, %s1343_s25  ;;  %s1166_s8 = smov 40  }
  0x3d   : > { %359 = vmatpush.msra.mxu0 %v332_v3  ;;  %v938_v18 = vld [vmem:[%s330_s16] ss:$0 sm:$0xff]  ;;  %s1170_s25 = smov 8  }
  0x3e   : > { %825 = vmatmul.msk.f32.vlgmr.msra.gmra.mxu0 %vm340_vm0, %v331_v4  ;;  %v374_v21 = vadd.f32 %v938_v18, %v370_v20  ;;  %v939_v18 = vld [vmem:[#allocation9] ss:$0 sm:$0xff] }
  0xbb   : > { %v361_v6 = vpop.f32.mrf.mxu0 }
  0xbc   : > { %v1336_v7 = vadd.f32 %v937_v5, %v361_v6 }
  0xbe   : > { %585 = vrot.lane.b32.xlu2 %v1336_v7, %s1157_s17  ;;  %441 = vrot.lane.b32.xlu1 %v1336_v7, %s1158_s19  ;;  %s1167_s17 = smov 56   ;;  %s1168_s19 = smov 48  }
  0xbf   : > { %376 = vrot.lane.b32.xlu0 %v1336_v7, %s1159_s20  ;;  %s1169_s20 = smov 16  }
  0xc6   : > { %512 = vrot.lane.b32.xlu2 %v1336_v7, %s1160_s27  ;;  %514 = vrot.lane.b32.xlu1 %v1336_v7, %s1161_s14  ;;  %s1171_s27 = smov 24   ;;  %s840_s14 = sshll.u32 %s1231_s28, 3 }
  0xc7   : > { %443 = vrot.lane.b32.xlu0 %v1336_v7, %s1162_s13  ;;  %s698_s16 = scalar_lea.hbm %s1422_s6, %s840_s14  ;;  %s327_s13 = scalar_lea.vmem [#allocation11], %s820_s18 }
  0xc8   : > { %s1096_s18 = scalar_lea.hbm %s1422_s6, 16 }
  0xcf   : > { %583 = vrot.lane.b32.xlu0 %v1336_v7, %s1163_s30  ;;  %s700_s30 = sshll.u32 %s327_s13, 4  ;;  %s701_s30 = int_to_ptr.vmem [resolvable:$true] %s700_s30 }
 0x118   : > { %v586_v8 = vpop.permute.xlu2 %585 }
 0x119   : > { %835 = vmatpush.xpose.msk.msrb.mxu0 %vm378_vm1, %v586_v8 }
 0x120   : > { %v513_v13 = vpop.permute.xlu2 %512 }
 0x130   : > { %v442_v9 = vpop.permute.xlu1 %441 }
 0x131   : > { %v377_v10 = vpop.permute.xlu0 %376 }
 0x132   : > { %826 = vmatpush.xpose.msk.msra.mxu1 %vm378_vm1, %v377_v10  ;;  %v658_v10 = vld [vmem:[#allocation8 + $0x18] sm:$0xff] }
 0x135   : > { %827 = vmatmul.msk.f32.vlgmr.msra.gmra.mxu1 %vm378_vm1, %v1336_v7 }
 0x138   : > { %v515_v11 = vpop.permute.xlu1 %514 }
 0x139   : > { %v444_v12 = vpop.permute.xlu0 %443  ;;  %832 = vmatpush.xpose.msk.msrb.mxu1 %vm378_vm1, %v515_v11  ;;  %v657_v11 = vld [vmem:[#allocation8 + $0x10] sm:$0xff] }
 0x13a   : > { %829 = vmatpush.xpose.msk.msra.mxu3 %vm378_vm1, %v444_v12  ;;  %v656_v12 = vld [vmem:[#allocation8 + $0x8] sm:$0xff] }
 0x13d   : > { %830 = vmatmul.msk.f32.vlgmr.msra.gmra.mxu3 %vm378_vm1, %v442_v9  ;;  %833 = vmatmul.msk.f32.vlgmr.msrb.gmra.mxu1 %vm378_vm1, %v513_v13  ;;  %v655_v13 = vld [vmem:[#allocation8] sm:$0xff] }
 0x13e   : > { %678 = vmatpush.msra.mxu1 %v658_v10 }
 0x140   : > { %679 = vmatpush.msra.mxu1 %v657_v11 }
 0x141   : > { %v584_v14 = vpop.permute.xlu0 %583 }
 0x142   : > { %836 = vmatmul.msk.f32.vlgmr.msrb.gmra.mxu0 %vm378_vm1, %v584_v14  ;;  %680 = vmatpush.msra.mxu1 %v656_v12 }
 0x144   : > { %681 = vmatpush.msra.mxu1 %v655_v13 }
 0x1b2   : > { %v400_v22 = vpop.f32.mrf.mxu1 }
 0x1b3   : > { %v401_v23 = vadd.f32 %v400_v22, %v374_v21 }
 0x1b5   : > { %v403_v24 = vsel %vm378_vm1, %v401_v23, -inf }
 0x1b6   : > { %404 = vmax.xlane.f32.xlu1 %v403_v24 }
 0x1ba   : > { %v537_v25 = vpop.f32.mrf.mxu1 }
 0x1bb   : > { %v538_v26 = vadd.f32 %v537_v25, %v374_v21 }
 0x1bd   : > { %v540_v27 = vsel %vm378_vm1, %v538_v26, -inf }
 0x1be   : > { %541 = vmax.xlane.f32.xlu0 %v540_v27 }
 0x1bf   : > { %v608_v31 = vpop.f32.mrf.mxu0 }
 0x1c0   : > { %v466_v28 = vpop.f32.mrf.mxu3  ;;  %v609_v32 = vadd.f32 %v608_v31, %v374_v21 }
 0x1c1   : > { %v467_v29 = vadd.f32 %v466_v28, %v374_v21 }
 0x1c2   : > { %v611_v33 = vsel %vm378_vm1, %v609_v32, -inf }
 0x1c3   : > { %v469_v30 = vsel %vm378_vm1, %v467_v29, -inf }
 0x1c4   : > { %470 = vmax.xlane.f32.xlu2 %v469_v30 }
 0x1cc   : > { %612 = vmax.xlane.f32.xlu2 %v611_v33 }
 0x1d2   : > { %414 = vrot.lane.b32.xlu0 %v1336_v7, %s1165_s29  ;;  %s702_s29 = sshll.u32 %s698_s16, 4  ;;  %s703_s29 = int_to_ptr.hbm [resolvable:$true] %s702_s29 }
 0x1da   : > { %622 = vrot.lane.b32.xlu0 %v1336_v7, %s1166_s8  ;;  %s688_s8 = scalar_lea.sflag [#allocation5], %s1314_s10 }
 0x229   : > { %v405_v34 = vpop.xlane.xlu1 %404 }
 0x22a   : > { %v406_v35 = vsub.f32 %v401_v23, %v405_v34 }
 0x22c   : > { %v407_v36 = vmul.f32 1.442695, %v406_v35 }
 0x22e   : > { %940 = vpow2.f32 %v407_v36 }
 0x231   : > { %v542_v37 = vpop.xlane.xlu0 %541 }
 0x232   : > { %v543_v38 = vsub.f32 %v538_v26, %v542_v37 }
 0x234   : > { %v941_v39 = vpop.eup %940  ;;  %v544_v40 = vmul.f32 1.442695, %v543_v38 }
 0x235   : > { %v409_v41 = vsel %vm378_vm1, %v941_v39, 0.0 }
 0x236   : > { %942 = vpow2.f32 %v544_v40  ;;  %410 = vadd.xlane.f32.xlu1 %v409_v41 }
 0x237   : > { %v471_v42 = vpop.xlane.xlu2 %470 }
 0x238   : > { %v472_v47 = vsub.f32 %v467_v29, %v471_v42 }
 0x23a   : > { %v473_v50 = vmul.f32 1.442695, %v472_v47 }
 0x23c   : > { %v943_v43 = vpop.eup %942 }
 0x23d   : > { %v546_v44 = vsel %vm378_vm1, %v943_v43, 0.0 }
 0x23e   : > { %547 = vadd.xlane.f32.xlu1 %v546_v44 }
 0x23f   : > { %v613_v45 = vpop.xlane.xlu2 %612 }
 0x240   : > { %v614_v46 = vsub.f32 %v609_v32, %v613_v45 }
 0x242   : > { %v615_v48 = vmul.f32 1.442695, %v614_v46 }
 0x244   : > { %944 = vpow2.f32 %v615_v48  ;;  %v415_v49 = vpop.permute.xlu0 %414 }
 0x245   : > { %435 = vmatpush.msra.mxu2 %v415_v49  ;;  %946 = vpow2.f32 %v473_v50 }
 0x24a   : > { %v945_v51 = vpop.eup %944 }
 0x24b   : > { %v617_v52 = vsel %vm378_vm1, %v945_v51, 0.0  ;;  %v947_v53 = vpop.eup %946 }
 0x24c   : > { %618 = vadd.xlane.f32.xlu2 %v617_v52  ;;  %v475_v54 = vsel %vm378_vm1, %v947_v53, 0.0  ;;  %v623_v62 = vpop.permute.xlu0 %622 }
 0x254   : > { %476 = vadd.xlane.f32.xlu2 %v475_v54 }
 0x257   : > { %480 = vrot.lane.b32.xlu1 %v1336_v7, %s1167_s17  ;;  %s1090_s17 = sshra.s32 %s703_s29, 4  ;;  %s1091_s17 = int_to_ptr.hbm [resolvable:$true] %s1090_s17 }
 0x258   : > { %s1092_s28 = scalar_lea.hbm %s1091_s17, 8  ;;  %p1097_p8 = scmp.lt.s32.totalorder %s1091_s17, %s1422_s6 }
 0x259   : > { %p1093_p3 = scmp.ne.s32.totalorder %s1091_s17, %s1092_s28  ;;  %p1098_p7 = scmp.lt.s32.totalorder %s1096_s18, %s1092_s28 }
 0x25b   : > { %p1094_p5 = pnand %p1093_p3, %p1283_p13  ;;  %p1099_p9 = por %p1098_p7, %p1097_p8 }
 0x25d   : > { %p1095_p12 = pneg %p1094_p5 }
 0x25f   : > { %p1100_p10 = pnand %p1099_p9, %p1095_p12 }
 0x26c   : > { %551 = vrot.lane.b32.xlu2 %v1336_v7, %s1168_s19 }
 0x2a9   : > { %v411_v55 = vpop.xlane.xlu1 %410 }
 0x2aa   : > { %948 = vrcp.f32 %v411_v55 }
 0x2b0   : > { %v949_v56 = vpop.eup %948 }
 0x2b1   : > { %v413_v57 = vmul.f32 %v949_v56, %v941_v39  ;;  %v548_v59 = vpop.xlane.xlu1 %547 }
 0x2b2   : > { %950 = vrcp.f32 %v548_v59 }
 0x2b3   : > { %828 = vmatmul.msk.f32.vlgmr.msra.gmra.mxu2 %vm378_vm1, %v413_v57 }
 0x2b8   : > { %v951_v63 = vpop.eup %950 }
 0x2b9   : > { %v550_v3 = vmul.f32 %v951_v63, %v943_v43 }
 0x2bf   : > { %v619_v58 = vpop.xlane.xlu2 %618 }
 0x2c7   : > { %v477_v60 = vpop.xlane.xlu2 %476 }
 0x2c8   : > { %952 = vrcp.f32 %v477_v60 }
 0x2c9   : > { %v481_v61 = vpop.permute.xlu1 %480  ;;  %954 = vrcp.f32 %v619_v58 }
 0x2ca   : > { %501 = vmatpush.msrb.mxu2 %v481_v61 }
 0x2cc   : > { %643 = vmatpush.msra.mxu2 %v623_v62 }
 0x2ce   : > { %v953_v0 = vpop.eup %952 }
 0x2cf   : > { %v552_v1 = vpop.permute.xlu2 %551  ;;  %v479_v2 = vmul.f32 %v953_v0, %v947_v53  ;;  %v955_v4 = vpop.eup %954 }
 0x2d0   : > { %572 = vmatpush.msrb.mxu3 %v552_v1  ;;  %v621_v5 = vmul.f32 %v955_v4, %v945_v51 }
 0x2d1   : > { %831 = vmatmul.msk.f32.vlgmr.msrb.gmra.mxu2 %vm378_vm1, %v479_v2  ;;  %834 = vmatmul.msk.f32.vlgmr.msrb.gmra.mxu3 %vm378_vm1, %v550_v3 }
 0x2d9   : > { %837 = vmatmul.msk.f32.vlgmr.msra.gmra.mxu2 %vm378_vm1, %v621_v5 }
 0x336   : > { %v437_v6 = vpop.f32.mrf.mxu2 }
 0x337   : > { %440 = vst.msk [vmem:[#allocation2] sm:$0xff] %vm378_vm1, %v437_v6 }
 0x354   : > { %v503_v7 = vpop.f32.mrf.mxu2  ;;  %v574_v8 = vpop.f32.mrf.mxu3 }
 0x355   : > { %578 = vrot.lane.b32.xlu1 %v574_v8, %s1169_s20  ;;  %507 = vrot.lane.b32.xlu0 %v503_v7, %s1170_s25 }
 0x35c   : > { %v645_v9 = vpop.f32.mrf.mxu2 }
 0x35d   : > { %649 = vrot.lane.b32.xlu0 %v645_v9, %s1171_s27 }
 0x3c7   : > { %v579_v14 = vpop.permute.xlu1 %578  ;;  %v508_v15 = vpop.permute.xlu0 %507 }
 0x3c8   : > { %511 = vst.msk [vmem:[#allocation2] sm:$0xff] %vm510_vm3, %v508_v15 }
 0x3c9   : > { %582 = vst.msk [vmem:[#allocation2] sm:$0xff] %vm581_vm4, %v579_v14 }
 0x3cf   : > { %v650_v16 = vpop.permute.xlu0 %649 }
 0x3d0   : > { %653 = vst.msk [vmem:[#allocation2] sm:$0xff] %vm652_vm5, %v650_v16 }
 0x3d7   : > { %v654_v17 = vld [vmem:[#allocation2] sm:$0xff] }
 0x3d8   : > { %838 = vmatmul.msk.f32.vlgmr.msra.gmra.mxu1 %vm340_vm0, %v654_v17 }
 0x455   : > { %v683_v19 = vpop.f32.mrf.mxu1 }
 0x456   : > { %v684_v20 = vadd.f32 %v939_v18, %v683_v19 }
 0x458   : > { %686 = vst.msk [vmem:[%s327_s13] sm:$0xff] %vm340_vm0, %v684_v20 }
 0x459   : > { %1103 = shalt.err (!%p1100_p10)
}
 0x45a   : > { %857 = dma.vmem_to_hbm [thread:$0]  (%p1283_p13), %s701_s30, 128, %s703_s29, %s688_s8  }
 0x45b PF: > { %s714_s10 = sand.u32 1, %s1138_s21   ;;  %p1429_p11 = scmp.ge.s32.totalorder %s1150_s24, 2 }
 0x45c   : > { %s715_s14 = scalar_lea.sflag [#allocation5], %s714_s10 }
 0x45d   : > { %p874_p0 = pnand %p1429_p11, %p1288_p4 }
 0x45f   : > { %p875_p2 = pneg %p874_p0 }
 0x461   : > { %1133 = dma.done.wait (%p875_p2), %s715_s14, 128  }
 0x462   : > { %1135 = vsyncadd (%p875_p2), %s715_s14, 4294967168  ;;  %p21_p6 = scmp.ge.s32.totalorder %s1263_s26, 4   ;;  %s1430_s21 = smov %s1142_s22 }
 0x463   : > { %s1431_s22 = smov %s1146_s23  ;;  %s1432_s23 = smov %s1275_s7 }
 0x464   : > { %s1433_s24 = smov %s1263_s26  ;;  %23 = sbr.rel (!%p21_p6) target bundleno = 7 (0x7), region = 104 }
 0x469   :  { %721 = vsyncpa [#allocation4], 1 }
 0x46a   :  { %723 = vsyncpa [#allocation4 + $0x1], 1 }
 0x46b   :  { %724 = vsyncpa [#allocation7], 1 }
 0x46c   :  { %725 = vsyncpa [#allocation10], 1 }
 0x46d   :  { %726 = vsyncpa [#allocation5], 1 }
 0x46e   :  { %728 = vsyncpa [#allocation5 + $0x1], 1 }

</bundles_post_ra>
